<compile_context>
chip_gen: v5e
topology: v5e:2x2
jax: 0.10.0
libtpu: 0.0.40
codegen_flags: <defaults>
</compile_context>

<pallas_src>
import functools

import jax
import jax.numpy as jnp
from jax import lax
from jax.experimental import pallas as pl
from jax.experimental.pallas import tpu as pltpu


def actor_critic_kernel(x_ref, h0_ref, c0_ref,
                        w_ih_t_ref, w_hh_t_ref, b_ref,
                        w_heads_ref, b_heads_ref,
                        out_ref):
    S = x_ref.shape[0]
    H = h0_ref.shape[1]
    G = 4 * H
    W = out_ref.shape[1]          # lane-dense output width (multiple of 128)

    # Input projection for all timesteps at once: (S, I) @ (I, 4H) + (b_ih+b_hh).
    # Kept as a value (vregs) and indexed with static slices inside the
    # unrolled loop.
    xg = (jnp.dot(x_ref[...], w_ih_t_ref[...],
                  preferred_element_type=jnp.float32)
          + b_ref[...])

    w_hh_t = w_hh_t_ref[...]

    # Per-lane constants so each step needs a single tanh over the whole
    # (1, 4H) gates row:
    #   i/f/o lanes: sigmoid(x) = 0.5 * tanh(0.5 * x) + 0.5  (scale=0.5, beta=0.5)
    #   g lanes    : tanh(x)                                  (scale=1.0, beta=0.0)
    lane = lax.broadcasted_iota(jnp.int32, (1, G), 1)
    is_g = (lane >= 2 * H) & (lane < 3 * H)
    scale = jnp.where(is_g, 1.0, 0.5).astype(jnp.float32)
    beta = jnp.where(is_g, 0.0, 0.5).astype(jnp.float32)

    h = h0_ref[...]
    c = c0_ref[...]
    hs_rows = []
    for t in range(S):  # fully unrolled: S is a static, tiny trip count
        gates = xg[t:t + 1, :] + jnp.dot(h, w_hh_t,
                                         preferred_element_type=jnp.float32)
        act = jnp.tanh(gates * scale) * scale + beta
        i = act[:, 0 * H:1 * H]
        f = act[:, 1 * H:2 * H]
        g = act[:, 2 * H:3 * H]
        o = act[:, 3 * H:4 * H]
        c = f * c + i * g
        h = o * jnp.tanh(c)
        hs_rows.append(h)

    # F.relu on the LSTM outputs, then the fused (value | action | zero-pad)
    # head matmul producing lane-dense (S, W) rows.
    hs = jnp.maximum(jnp.concatenate(hs_rows, axis=0), 0.0)        # (S, H)
    heads = (jnp.dot(hs, w_heads_ref[...],
                     preferred_element_type=jnp.float32)
             + b_heads_ref[...])                                   # (S, W)

    # Final LSTM state packed into one extra lane-dense row: [h_n | c_n | 0].
    parts = [h, c]
    pad = W - 2 * H
    if pad > 0:
        parts.append(jnp.zeros((1, pad), jnp.float32))
    state_row = jnp.concatenate(parts, axis=1)                     # (1, W)

    # Single unmasked whole-ref store of the (S + 1, W) block.
    out_ref[...] = jnp.concatenate([heads, state_row], axis=0)


def prepare_params(params):
    """One-time transforms (transposes, bias fusion, head fusion + lane pad)."""
    H = params["w_hh"].shape[1]
    A = params["w_act"].shape[0]
    n_head = 1 + A                                   # [value | action]
    # Output width must hold both the fused heads and the packed (h_n, c_n)
    # row, rounded up to a lane-dense multiple of 128.
    out_lanes = ((max(n_head, 2 * H) + 127) // 128) * 128

    w_heads = jnp.concatenate([params["w_val"].T, params["w_act"].T], axis=1)
    w_heads = jnp.pad(w_heads, ((0, 0), (0, out_lanes - n_head)))
    b_heads = jnp.concatenate([params["b_val"], params["b_act"]]).reshape(1, n_head)
    b_heads = jnp.pad(b_heads, ((0, 0), (0, out_lanes - n_head)))

    return {
        "w_ih_t": params["w_ih"].T,                                  # (I, 4H)
        "w_hh_t": params["w_hh"].T,                                  # (H, 4H)
        "b": (params["b_ih"] + params["b_hh"]).reshape(1, 4 * H),    # (1, 4H)
        "w_heads": w_heads,                                          # (H, W)
        "b_heads": b_heads,                                          # (1, W)
    }


@functools.partial(jax.jit, static_argnums=(3,))
def actor_critic_forward(prepared, state, mem_state, num_actions):
    """Mirrors ActorCritic.forward((state, mem_state))."""
    h0, c0 = mem_state                       # each (1, 1, H)
    S = state.shape[0]
    H = prepared["w_hh_t"].shape[0]
    W = prepared["w_heads"].shape[1]

    vmem = pl.BlockSpec(memory_space=pltpu.MemorySpace.VMEM)
    out = pl.pallas_call(
        actor_critic_kernel,
        out_shape=jax.ShapeDtypeStruct((S + 1, W), jnp.float32),
        in_specs=[vmem] * 8,
        out_specs=vmem,
    )(state, h0.reshape(1, H), c0.reshape(1, H),
      prepared["w_ih_t"], prepared["w_hh_t"], prepared["b"],
      prepared["w_heads"], prepared["b_heads"])

    # Restore PyTorch output shapes: (S,1,1), (S,1,A), ((1,1,H), (1,1,H))
    value = out[:S, 0:1].reshape(S, 1, 1)
    action = out[:S, 1:1 + num_actions].reshape(S, 1, num_actions)
    h_n = out[S:S + 1, 0:H].reshape(1, 1, H)
    c_n = out[S:S + 1, H:2 * H].reshape(1, 1, H)
    return value, action, (h_n, c_n)


def reference_forward(params, state, mem_state):
    """Pure-JAX reference matching torch semantics (for correctness check)."""
    h0, c0 = mem_state
    H = h0.shape[-1]
    h = h0.reshape(H)
    c = c0.reshape(H)
    w_ih, w_hh = params["w_ih"], params["w_hh"]
    b = params["b_ih"] + params["b_hh"]

    def step(carry, x_t):
        h, c = carry
        gates = x_t @ w_ih.T + h @ w_hh.T + b
        i = jax.nn.sigmoid(gates[0 * H:1 * H])
        f = jax.nn.sigmoid(gates[1 * H:2 * H])
        g = jnp.tanh(gates[2 * H:3 * H])
        o = jax.nn.sigmoid(gates[3 * H:4 * H])
        c_new = f * c + i * g
        h_new = o * jnp.tanh(c_new)
        return (h_new, c_new), h_new

    (h_fin, c_fin), hs = lax.scan(step, (h, c), state)
    hs = jnp.maximum(hs, 0.0)
    value = hs @ params["w_val"].T + params["b_val"]
    action = hs @ params["w_act"].T + params["b_act"]
    S = state.shape[0]
    return (value.reshape(S, 1, 1), action.reshape(S, 1, -1),
            (h_fin.reshape(1, 1, H), c_fin.reshape(1, 1, H)))


def init_params(key, input_dim, hidden_dim, output_dim):
    ks = jax.random.split(key, 10)
    s = 1.0 / jnp.sqrt(hidden_dim)
    u = lambda k, shape: jax.random.uniform(k, shape, jnp.float32, -s, s)
    return {
        "w_ih": u(ks[0], (4 * hidden_dim, input_dim)),
        "w_hh": u(ks[1], (4 * hidden_dim, hidden_dim)),
        "b_ih": u(ks[2], (4 * hidden_dim,)),
        "b_hh": u(ks[3], (4 * hidden_dim,)),
        "w_act": u(ks[4], (output_dim, hidden_dim)),
        "b_act": u(ks[5], (output_dim,)),
        "w_val": u(ks[6], (1, hidden_dim)),
        "b_val": u(ks[7], (1,)),
        "h0": jax.random.normal(ks[8], (1, 1, hidden_dim), jnp.float32),
        "c0": jax.random.normal(ks[9], (1, 1, hidden_dim), jnp.float32),
    }


if __name__ == "__main__":
    SEQ, INPUT_DIM, HIDDEN_DIM, OUTPUT_DIM = 8, 32, 32, 4

    key = jax.random.PRNGKey(0)
    pkey, xkey = jax.random.split(key)
    params = init_params(pkey, INPUT_DIM, HIDDEN_DIM, OUTPUT_DIM)
    prepared = prepare_params(params)                 # one-time, hoisted

    state = jax.random.normal(xkey, (SEQ, INPUT_DIM), jnp.float32)
    mem_state = (params["h0"], params["c0"])          # get_init_states()

    value, action, (h_n, c_n) = jax.block_until_ready(
        actor_critic_forward(prepared, state, mem_state, OUTPUT_DIM))

    value_r, action_r, (h_r, c_r) = reference_forward(params, state, mem_state)

    assert value.shape == (SEQ, 1, 1)
    assert action.shape == (SEQ, 1, OUTPUT_DIM)
    assert h_n.shape == (1, 1, HIDDEN_DIM) and c_n.shape == (1, 1, HIDDEN_DIM)
    for a, b in ((value, value_r), (action, action_r), (h_n, h_r), (c_n, c_r)):
        assert jnp.allclose(a, b, rtol=5e-3, atol=5e-3), "mismatch vs reference"

    # NOTE: torch.distributions.Categorical is imported by the PyTorch module
    # but not used in forward(), so nothing to translate there.
    print("KERNEL_OK")
</pallas_src>

<mosaic_0001>
module attributes {stable_mosaic.version = 11 : i64} {
  func.func @actor_critic_kernel(%arg0: memref<8x32xf32, #tpu.memory_space<vmem>>, %arg1: memref<1x32xf32, #tpu.memory_space<vmem>>, %arg2: memref<1x32xf32, #tpu.memory_space<vmem>>, %arg3: memref<32x128xf32, #tpu.memory_space<vmem>>, %arg4: memref<32x128xf32, #tpu.memory_space<vmem>>, %arg5: memref<1x128xf32, #tpu.memory_space<vmem>>, %arg6: memref<32x128xf32, #tpu.memory_space<vmem>>, %arg7: memref<1x128xf32, #tpu.memory_space<vmem>>, %arg8: memref<9x128xf32, #tpu.memory_space<vmem>>) attributes {dimension_semantics = [], scalar_prefetch = 0 : i64, scratch_operands = 0 : i64, tpu.core_type = #tpu.core_type<tc>} {
    %c0 = arith.constant 0 : index
    %c0_0 = arith.constant 0 : index
    %0 = vector.load %arg0[%c0, %c0_0] : memref<8x32xf32, #tpu.memory_space<vmem>>, vector<8x32xf32>
    %c0_1 = arith.constant 0 : index
    %c0_2 = arith.constant 0 : index
    %1 = vector.load %arg3[%c0_1, %c0_2] : memref<32x128xf32, #tpu.memory_space<vmem>>, vector<32x128xf32>
    %cst = arith.constant dense<0.000000e+00> : vector<8x128xf32>
    %2 = tpu.matmul %0, %1, %cst {dimension_numbers = #tpu.dot_dimension_numbers<[1], [0], [0], [1], [0, 0, 1, 1], [], []>} : vector<8x32xf32>, vector<32x128xf32>, vector<8x128xf32> -> vector<8x128xf32>
    %c0_3 = arith.constant 0 : index
    %c0_4 = arith.constant 0 : index
    %3 = vector.load %arg5[%c0_3, %c0_4] : memref<1x128xf32, #tpu.memory_space<vmem>>, vector<1x128xf32>
    %4 = vector.broadcast %3 : vector<1x128xf32> to vector<8x128xf32>
    %5 = arith.addf %2, %4 : vector<8x128xf32>
    %c0_5 = arith.constant 0 : index
    %c0_6 = arith.constant 0 : index
    %6 = vector.load %arg4[%c0_5, %c0_6] : memref<32x128xf32, #tpu.memory_space<vmem>>, vector<32x128xf32>
    %7 = tpu.iota {dimensions = array<i32: 1>} : vector<1x128xi32>
    %c64_i32 = arith.constant 64 : i32
    %8 = vector.broadcast %c64_i32 : i32 to vector<1x128xi32>
    %9 = arith.cmpi sge, %7, %8 : vector<1x128xi32>
    %c96_i32 = arith.constant 96 : i32
    %10 = vector.broadcast %c96_i32 : i32 to vector<1x128xi32>
    %11 = arith.cmpi slt, %7, %10 : vector<1x128xi32>
    %12 = arith.andi %9, %11 : vector<1x128xi1>
    %cst_7 = arith.constant 1.000000e+00 : f32
    %cst_8 = arith.constant 5.000000e-01 : f32
    %13 = vector.broadcast %cst_7 : f32 to vector<1x128xf32>
    %14 = vector.broadcast %cst_8 : f32 to vector<1x128xf32>
    %15 = arith.select %12, %13, %14 : vector<1x128xi1>, vector<1x128xf32>
    %cst_9 = arith.constant 0.000000e+00 : f32
    %cst_10 = arith.constant 5.000000e-01 : f32
    %16 = vector.broadcast %cst_9 : f32 to vector<1x128xf32>
    %17 = vector.broadcast %cst_10 : f32 to vector<1x128xf32>
    %18 = arith.select %12, %16, %17 : vector<1x128xi1>, vector<1x128xf32>
    %c0_11 = arith.constant 0 : index
    %c0_12 = arith.constant 0 : index
    %19 = vector.load %arg1[%c0_11, %c0_12] : memref<1x32xf32, #tpu.memory_space<vmem>>, vector<1x32xf32>
    %c0_13 = arith.constant 0 : index
    %c0_14 = arith.constant 0 : index
    %20 = vector.load %arg2[%c0_13, %c0_14] : memref<1x32xf32, #tpu.memory_space<vmem>>, vector<1x32xf32>
    %21 = vector.extract_strided_slice %5 {offsets = [0, 0], sizes = [1, 128], strides = [1, 1]} : vector<8x128xf32> to vector<1x128xf32>
    %cst_15 = arith.constant dense<0.000000e+00> : vector<1x128xf32>
    %22 = tpu.matmul %19, %6, %cst_15 {dimension_numbers = #tpu.dot_dimension_numbers<[1], [0], [0], [1], [0, 0, 1, 1], [], []>} : vector<1x32xf32>, vector<32x128xf32>, vector<1x128xf32> -> vector<1x128xf32>
    %23 = arith.addf %21, %22 : vector<1x128xf32>
    %24 = arith.mulf %23, %15 : vector<1x128xf32>
    %25 = math.tanh %24 : vector<1x128xf32>
    %26 = arith.mulf %25, %15 : vector<1x128xf32>
    %27 = arith.addf %26, %18 : vector<1x128xf32>
    %28 = vector.extract_strided_slice %27 {offsets = [0, 0], sizes = [1, 32], strides = [1, 1]} : vector<1x128xf32> to vector<1x32xf32>
    %29 = vector.extract_strided_slice %27 {offsets = [0, 32], sizes = [1, 32], strides = [1, 1]} : vector<1x128xf32> to vector<1x32xf32>
    %30 = vector.extract_strided_slice %27 {offsets = [0, 64], sizes = [1, 32], strides = [1, 1]} : vector<1x128xf32> to vector<1x32xf32>
    %31 = vector.extract_strided_slice %27 {offsets = [0, 96], sizes = [1, 32], strides = [1, 1]} : vector<1x128xf32> to vector<1x32xf32>
    %32 = arith.mulf %29, %20 : vector<1x32xf32>
    %33 = arith.mulf %28, %30 : vector<1x32xf32>
    %34 = arith.addf %32, %33 : vector<1x32xf32>
    %35 = math.tanh %34 : vector<1x32xf32>
    %36 = arith.mulf %31, %35 : vector<1x32xf32>
    %37 = vector.extract_strided_slice %5 {offsets = [1, 0], sizes = [1, 128], strides = [1, 1]} : vector<8x128xf32> to vector<1x128xf32>
    %cst_16 = arith.constant dense<0.000000e+00> : vector<1x128xf32>
    %38 = tpu.matmul %36, %6, %cst_16 {dimension_numbers = #tpu.dot_dimension_numbers<[1], [0], [0], [1], [0, 0, 1, 1], [], []>} : vector<1x32xf32>, vector<32x128xf32>, vector<1x128xf32> -> vector<1x128xf32>
    %39 = arith.addf %37, %38 : vector<1x128xf32>
    %40 = arith.mulf %39, %15 : vector<1x128xf32>
    %41 = math.tanh %40 : vector<1x128xf32>
    %42 = arith.mulf %41, %15 : vector<1x128xf32>
    %43 = arith.addf %42, %18 : vector<1x128xf32>
    %44 = vector.extract_strided_slice %43 {offsets = [0, 0], sizes = [1, 32], strides = [1, 1]} : vector<1x128xf32> to vector<1x32xf32>
    %45 = vector.extract_strided_slice %43 {offsets = [0, 32], sizes = [1, 32], strides = [1, 1]} : vector<1x128xf32> to vector<1x32xf32>
    %46 = vector.extract_strided_slice %43 {offsets = [0, 64], sizes = [1, 32], strides = [1, 1]} : vector<1x128xf32> to vector<1x32xf32>
    %47 = vector.extract_strided_slice %43 {offsets = [0, 96], sizes = [1, 32], strides = [1, 1]} : vector<1x128xf32> to vector<1x32xf32>
    %48 = arith.mulf %45, %34 : vector<1x32xf32>
    %49 = arith.mulf %44, %46 : vector<1x32xf32>
    %50 = arith.addf %48, %49 : vector<1x32xf32>
    %51 = math.tanh %50 : vector<1x32xf32>
    %52 = arith.mulf %47, %51 : vector<1x32xf32>
    %53 = vector.extract_strided_slice %5 {offsets = [2, 0], sizes = [1, 128], strides = [1, 1]} : vector<8x128xf32> to vector<1x128xf32>
    %cst_17 = arith.constant dense<0.000000e+00> : vector<1x128xf32>
    %54 = tpu.matmul %52, %6, %cst_17 {dimension_numbers = #tpu.dot_dimension_numbers<[1], [0], [0], [1], [0, 0, 1, 1], [], []>} : vector<1x32xf32>, vector<32x128xf32>, vector<1x128xf32> -> vector<1x128xf32>
    %55 = arith.addf %53, %54 : vector<1x128xf32>
    %56 = arith.mulf %55, %15 : vector<1x128xf32>
    %57 = math.tanh %56 : vector<1x128xf32>
    %58 = arith.mulf %57, %15 : vector<1x128xf32>
    %59 = arith.addf %58, %18 : vector<1x128xf32>
    %60 = vector.extract_strided_slice %59 {offsets = [0, 0], sizes = [1, 32], strides = [1, 1]} : vector<1x128xf32> to vector<1x32xf32>
    %61 = vector.extract_strided_slice %59 {offsets = [0, 32], sizes = [1, 32], strides = [1, 1]} : vector<1x128xf32> to vector<1x32xf32>
    %62 = vector.extract_strided_slice %59 {offsets = [0, 64], sizes = [1, 32], strides = [1, 1]} : vector<1x128xf32> to vector<1x32xf32>
    %63 = vector.extract_strided_slice %59 {offsets = [0, 96], sizes = [1, 32], strides = [1, 1]} : vector<1x128xf32> to vector<1x32xf32>
    %64 = arith.mulf %61, %50 : vector<1x32xf32>
    %65 = arith.mulf %60, %62 : vector<1x32xf32>
    %66 = arith.addf %64, %65 : vector<1x32xf32>
    %67 = math.tanh %66 : vector<1x32xf32>
    %68 = arith.mulf %63, %67 : vector<1x32xf32>
    %69 = vector.extract_strided_slice %5 {offsets = [3, 0], sizes = [1, 128], strides = [1, 1]} : vector<8x128xf32> to vector<1x128xf32>
    %cst_18 = arith.constant dense<0.000000e+00> : vector<1x128xf32>
    %70 = tpu.matmul %68, %6, %cst_18 {dimension_numbers = #tpu.dot_dimension_numbers<[1], [0], [0], [1], [0, 0, 1, 1], [], []>} : vector<1x32xf32>, vector<32x128xf32>, vector<1x128xf32> -> vector<1x128xf32>
    %71 = arith.addf %69, %70 : vector<1x128xf32>
    %72 = arith.mulf %71, %15 : vector<1x128xf32>
    %73 = math.tanh %72 : vector<1x128xf32>
    %74 = arith.mulf %73, %15 : vector<1x128xf32>
    %75 = arith.addf %74, %18 : vector<1x128xf32>
    %76 = vector.extract_strided_slice %75 {offsets = [0, 0], sizes = [1, 32], strides = [1, 1]} : vector<1x128xf32> to vector<1x32xf32>
    %77 = vector.extract_strided_slice %75 {offsets = [0, 32], sizes = [1, 32], strides = [1, 1]} : vector<1x128xf32> to vector<1x32xf32>
    %78 = vector.extract_strided_slice %75 {offsets = [0, 64], sizes = [1, 32], strides = [1, 1]} : vector<1x128xf32> to vector<1x32xf32>
    %79 = vector.extract_strided_slice %75 {offsets = [0, 96], sizes = [1, 32], strides = [1, 1]} : vector<1x128xf32> to vector<1x32xf32>
    %80 = arith.mulf %77, %66 : vector<1x32xf32>
    %81 = arith.mulf %76, %78 : vector<1x32xf32>
    %82 = arith.addf %80, %81 : vector<1x32xf32>
    %83 = math.tanh %82 : vector<1x32xf32>
    %84 = arith.mulf %79, %83 : vector<1x32xf32>
    %85 = vector.extract_strided_slice %5 {offsets = [4, 0], sizes = [1, 128], strides = [1, 1]} : vector<8x128xf32> to vector<1x128xf32>
    %cst_19 = arith.constant dense<0.000000e+00> : vector<1x128xf32>
    %86 = tpu.matmul %84, %6, %cst_19 {dimension_numbers = #tpu.dot_dimension_numbers<[1], [0], [0], [1], [0, 0, 1, 1], [], []>} : vector<1x32xf32>, vector<32x128xf32>, vector<1x128xf32> -> vector<1x128xf32>
    %87 = arith.addf %85, %86 : vector<1x128xf32>
    %88 = arith.mulf %87, %15 : vector<1x128xf32>
    %89 = math.tanh %88 : vector<1x128xf32>
    %90 = arith.mulf %89, %15 : vector<1x128xf32>
    %91 = arith.addf %90, %18 : vector<1x128xf32>
    %92 = vector.extract_strided_slice %91 {offsets = [0, 0], sizes = [1, 32], strides = [1, 1]} : vector<1x128xf32> to vector<1x32xf32>
    %93 = vector.extract_strided_slice %91 {offsets = [0, 32], sizes = [1, 32], strides = [1, 1]} : vector<1x128xf32> to vector<1x32xf32>
    %94 = vector.extract_strided_slice %91 {offsets = [0, 64], sizes = [1, 32], strides = [1, 1]} : vector<1x128xf32> to vector<1x32xf32>
    %95 = vector.extract_strided_slice %91 {offsets = [0, 96], sizes = [1, 32], strides = [1, 1]} : vector<1x128xf32> to vector<1x32xf32>
    %96 = arith.mulf %93, %82 : vector<1x32xf32>
    %97 = arith.mulf %92, %94 : vector<1x32xf32>
    %98 = arith.addf %96, %97 : vector<1x32xf32>
    %99 = math.tanh %98 : vector<1x32xf32>
    %100 = arith.mulf %95, %99 : vector<1x32xf32>
    %101 = vector.extract_strided_slice %5 {offsets = [5, 0], sizes = [1, 128], strides = [1, 1]} : vector<8x128xf32> to vector<1x128xf32>
    %cst_20 = arith.constant dense<0.000000e+00> : vector<1x128xf32>
    %102 = tpu.matmul %100, %6, %cst_20 {dimension_numbers = #tpu.dot_dimension_numbers<[1], [0], [0], [1], [0, 0, 1, 1], [], []>} : vector<1x32xf32>, vector<32x128xf32>, vector<1x128xf32> -> vector<1x128xf32>
    %103 = arith.addf %101, %102 : vector<1x128xf32>
    %104 = arith.mulf %103, %15 : vector<1x128xf32>
    %105 = math.tanh %104 : vector<1x128xf32>
    %106 = arith.mulf %105, %15 : vector<1x128xf32>
    %107 = arith.addf %106, %18 : vector<1x128xf32>
    %108 = vector.extract_strided_slice %107 {offsets = [0, 0], sizes = [1, 32], strides = [1, 1]} : vector<1x128xf32> to vector<1x32xf32>
    %109 = vector.extract_strided_slice %107 {offsets = [0, 32], sizes = [1, 32], strides = [1, 1]} : vector<1x128xf32> to vector<1x32xf32>
    %110 = vector.extract_strided_slice %107 {offsets = [0, 64], sizes = [1, 32], strides = [1, 1]} : vector<1x128xf32> to vector<1x32xf32>
    %111 = vector.extract_strided_slice %107 {offsets = [0, 96], sizes = [1, 32], strides = [1, 1]} : vector<1x128xf32> to vector<1x32xf32>
    %112 = arith.mulf %109, %98 : vector<1x32xf32>
    %113 = arith.mulf %108, %110 : vector<1x32xf32>
    %114 = arith.addf %112, %113 : vector<1x32xf32>
    %115 = math.tanh %114 : vector<1x32xf32>
    %116 = arith.mulf %111, %115 : vector<1x32xf32>
    %117 = vector.extract_strided_slice %5 {offsets = [6, 0], sizes = [1, 128], strides = [1, 1]} : vector<8x128xf32> to vector<1x128xf32>
    %cst_21 = arith.constant dense<0.000000e+00> : vector<1x128xf32>
    %118 = tpu.matmul %116, %6, %cst_21 {dimension_numbers = #tpu.dot_dimension_numbers<[1], [0], [0], [1], [0, 0, 1, 1], [], []>} : vector<1x32xf32>, vector<32x128xf32>, vector<1x128xf32> -> vector<1x128xf32>
    %119 = arith.addf %117, %118 : vector<1x128xf32>
    %120 = arith.mulf %119, %15 : vector<1x128xf32>
    %121 = math.tanh %120 : vector<1x128xf32>
    %122 = arith.mulf %121, %15 : vector<1x128xf32>
    %123 = arith.addf %122, %18 : vector<1x128xf32>
    %124 = vector.extract_strided_slice %123 {offsets = [0, 0], sizes = [1, 32], strides = [1, 1]} : vector<1x128xf32> to vector<1x32xf32>
    %125 = vector.extract_strided_slice %123 {offsets = [0, 32], sizes = [1, 32], strides = [1, 1]} : vector<1x128xf32> to vector<1x32xf32>
    %126 = vector.extract_strided_slice %123 {offsets = [0, 64], sizes = [1, 32], strides = [1, 1]} : vector<1x128xf32> to vector<1x32xf32>
    %127 = vector.extract_strided_slice %123 {offsets = [0, 96], sizes = [1, 32], strides = [1, 1]} : vector<1x128xf32> to vector<1x32xf32>
    %128 = arith.mulf %125, %114 : vector<1x32xf32>
    %129 = arith.mulf %124, %126 : vector<1x32xf32>
    %130 = arith.addf %128, %129 : vector<1x32xf32>
    %131 = math.tanh %130 : vector<1x32xf32>
    %132 = arith.mulf %127, %131 : vector<1x32xf32>
    %133 = vector.extract_strided_slice %5 {offsets = [7, 0], sizes = [1, 128], strides = [1, 1]} : vector<8x128xf32> to vector<1x128xf32>
    %cst_22 = arith.constant dense<0.000000e+00> : vector<1x128xf32>
    %134 = tpu.matmul %132, %6, %cst_22 {dimension_numbers = #tpu.dot_dimension_numbers<[1], [0], [0], [1], [0, 0, 1, 1], [], []>} : vector<1x32xf32>, vector<32x128xf32>, vector<1x128xf32> -> vector<1x128xf32>
    %135 = arith.addf %133, %134 : vector<1x128xf32>
    %136 = arith.mulf %135, %15 : vector<1x128xf32>
    %137 = math.tanh %136 : vector<1x128xf32>
    %138 = arith.mulf %137, %15 : vector<1x128xf32>
    %139 = arith.addf %138, %18 : vector<1x128xf32>
    %140 = vector.extract_strided_slice %139 {offsets = [0, 0], sizes = [1, 32], strides = [1, 1]} : vector<1x128xf32> to vector<1x32xf32>
    %141 = vector.extract_strided_slice %139 {offsets = [0, 32], sizes = [1, 32], strides = [1, 1]} : vector<1x128xf32> to vector<1x32xf32>
    %142 = vector.extract_strided_slice %139 {offsets = [0, 64], sizes = [1, 32], strides = [1, 1]} : vector<1x128xf32> to vector<1x32xf32>
    %143 = vector.extract_strided_slice %139 {offsets = [0, 96], sizes = [1, 32], strides = [1, 1]} : vector<1x128xf32> to vector<1x32xf32>
    %144 = arith.mulf %141, %130 : vector<1x32xf32>
    %145 = arith.mulf %140, %142 : vector<1x32xf32>
    %146 = arith.addf %144, %145 : vector<1x32xf32>
    %147 = math.tanh %146 : vector<1x32xf32>
    %148 = arith.mulf %143, %147 : vector<1x32xf32>
    %149 = tpu.concatenate %36, %52, %68, %84, %100, %116, %132, %148 in 0 : vector<1x32xf32>, vector<1x32xf32>, vector<1x32xf32>, vector<1x32xf32>, vector<1x32xf32>, vector<1x32xf32>, vector<1x32xf32>, vector<1x32xf32> -> vector<8x32xf32>
    %cst_23 = arith.constant 0.000000e+00 : f32
    %150 = vector.broadcast %cst_23 : f32 to vector<8x32xf32>
    %151 = arith.maximumf %149, %150 : vector<8x32xf32>
    %c0_24 = arith.constant 0 : index
    %c0_25 = arith.constant 0 : index
    %152 = vector.load %arg6[%c0_24, %c0_25] : memref<32x128xf32, #tpu.memory_space<vmem>>, vector<32x128xf32>
    %cst_26 = arith.constant dense<0.000000e+00> : vector<8x128xf32>
    %153 = tpu.matmul %151, %152, %cst_26 {dimension_numbers = #tpu.dot_dimension_numbers<[1], [0], [0], [1], [0, 0, 1, 1], [], []>} : vector<8x32xf32>, vector<32x128xf32>, vector<8x128xf32> -> vector<8x128xf32>
    %c0_27 = arith.constant 0 : index
    %c0_28 = arith.constant 0 : index
    %154 = vector.load %arg7[%c0_27, %c0_28] : memref<1x128xf32, #tpu.memory_space<vmem>>, vector<1x128xf32>
    %155 = vector.broadcast %154 : vector<1x128xf32> to vector<8x128xf32>
    %156 = arith.addf %153, %155 : vector<8x128xf32>
    %cst_29 = arith.constant 0.000000e+00 : f32
    %157 = vector.broadcast %cst_29 : f32 to vector<1x64xf32>
    %158 = tpu.concatenate %148, %146, %157 in 1 : vector<1x32xf32>, vector<1x32xf32>, vector<1x64xf32> -> vector<1x128xf32>
    %159 = tpu.concatenate %156, %158 in 0 : vector<8x128xf32>, vector<1x128xf32> -> vector<9x128xf32>
    %c0_30 = arith.constant 0 : index
    %c0_31 = arith.constant 0 : index
    %160 = vector.load %arg8[%c0_30, %c0_31] : memref<9x128xf32, #tpu.memory_space<vmem>>, vector<9x128xf32>
    tpu.vector_store %arg8[%c0_30, %c0_31], %159 {strides = array<i32>} : memref<9x128xf32, #tpu.memory_space<vmem>>, vector<9x128xf32>,
    return
  }
}

</mosaic_0001>

<bundles_post_ra>
// kernel: actor_critic_forward.1
= control target key start
LH: loop header
LB: loop body
LE: loop exit
PB: predicated region body
PF: predicated region fallthrough
CT: control target
= control target key end

     0   :  { %13 = vsyncpa [#allocation3], 0  ;;  %s1044_s0 = inlined_call_operand.hbm [shape: f32[8,32], index: 0, kind: input, shape index: {}]   ;;  %s1045_s1 = inlined_call_operand.vmem [shape: f32[1,32], index: 1, kind: input, shape index: {}]   ;;  %s1046_s2 = inlined_call_operand.vmem [shape: f32[1,32], index: 2, kind: input, shape index: {}]   ;;  %s1047_s3 = inlined_call_operand.hbm [shape: f32[32,128], index: 3, kind: input, shape index: {}]   ;;  %s1048_s4 = inlined_call_operand.hbm [shape: f32[32,128], index: 4, kind: input, shape index: {}]   ;;  %s1049_s5 = inlined_call_operand.hbm [shape: f32[1,128], index: 5, kind: input, shape index: {}]   ;;  %s1050_s6 = inlined_call_operand.hbm [shape: f32[32,128], index: 6, kind: input, shape index: {}]   ;;  %s1051_s7 = inlined_call_operand.hbm [shape: f32[1,128], index: 7, kind: input, shape index: {}]   ;;  %s1052_s8 = inlined_call_operand.vmem [shape: f32[9,128], index: 8, kind: output, shape index: {}]  }
   0x1   :  { %14 = vsyncpa [#allocation5], 0 }
   0x2   :  { %15 = vsyncpa [#allocation8], 0  ;;  %s36_s29 = sshll.u32 %s1047_s3, 4  ;;  %s37_s29 = int_to_ptr.hbm [resolvable:$true] %s36_s29 }
   0x3   :  { %16 = vsyncpa [#allocation11], 0  ;;  %s866_s30 = smov [#allocation4]   ;;  %s63_s12 = sshll.u32 %s1049_s5, 4  ;;  %s64_s12 = int_to_ptr.hbm [resolvable:$true] %s63_s12 }
   0x4   :  { %s38_s9 = sshll.u32 %s866_s30, 4  ;;  %s867_s13 = smov 128   ;;  %s39_s9 = int_to_ptr.vmem [resolvable:$true] %s38_s9 }
   0x5   :  { %s868_s14 = smov 8   ;;  %s869_s15 = smov [#allocation7]  }
   0x6   :  { %44 = dma.hbm_to_vmem [thread:$0]  %s37_s29, 512, %s39_s9, [#allocation5], %s867_s13, %s867_s13, %s868_s14  }
   0x7   :  { %s65_s16 = sshll.u32 %s869_s15, 4  ;;  %s22_s18 = sshll.u32 %s1044_s0, 4  ;;  %s66_s16 = int_to_ptr.vmem [resolvable:$true] %s65_s16  ;;  %s23_s18 = int_to_ptr.hbm [resolvable:$true] %s22_s18 }
   0x8   :  { %68 = dma.hbm_to_vmem [thread:$0]  %s64_s12, 16, %s66_s16, [#allocation8]  }
   0x9   :  { %s49_s5 = sshll.u32 %s1048_s4, 4  ;;  %s870_s21 = smov [#allocation2]   ;;  %s50_s5 = int_to_ptr.hbm [resolvable:$true] %s49_s5 }
   0xa   :  { %s24_s22 = sshll.u32 %s870_s21, 4  ;;  %s871_s23 = smov [#allocation6]   ;;  %s25_s22 = int_to_ptr.vmem [resolvable:$true] %s24_s22 }
   0xb   :  { %27 = dma.hbm_to_vmem [thread:$0]  %s23_s18, 128, %s25_s22, [#allocation3]  }
   0xc   :  { %s51_s24 = sshll.u32 %s871_s23, 4  ;;  %s73_s27 = sshll.u32 %s1050_s6, 4  ;;  %s52_s24 = int_to_ptr.vmem [resolvable:$true] %s51_s24  ;;  %s74_s27 = int_to_ptr.hbm [resolvable:$true] %s73_s27 }
   0xd   :  { %57 = dma.hbm_to_vmem [thread:$0]  %s50_s5, 512, %s52_s24, [#allocation5], %s867_s13, %s867_s13, %s868_s14  }
   0xe   :  { %s87_s4 = sshll.u32 %s1051_s7, 4  ;;  %s872_s29 = smov [#allocation9]   ;;  %s88_s4 = int_to_ptr.hbm [resolvable:$true] %s87_s4 }
   0xf   :  { %s75_s30 = sshll.u32 %s872_s29, 4  ;;  %s873_s9 = smov [#allocation10]   ;;  %s76_s30 = int_to_ptr.vmem [resolvable:$true] %s75_s30 }
  0x10   :  { %81 = dma.hbm_to_vmem [thread:$0]  %s74_s27, 512, %s76_s30, [#allocation8], %s867_s13, %s867_s13, %s868_s14  }
  0x11   :  { %s89_s6 = sshll.u32 %s873_s9, 4  ;;  %s90_s6 = int_to_ptr.vmem [resolvable:$true] %s89_s6 }
  0x12   :  { %92 = dma.hbm_to_vmem [thread:$0]  %s88_s4, 16, %s90_s6, [#allocation11]  }
  0x13   :  { %858 = dma.done.wait [#allocation3], 128  }
  0x14   :  { %859 = vsyncadd [#allocation3], 4294967168 }
  0x15   :  { %860 = dma.done.wait [#allocation5], 1024  }
  0x16   :  { %861 = vsyncadd [#allocation5], 4294966272 }
  0x17   :  { %862 = dma.done.wait [#allocation8], 528  }
  0x18   :  { %863 = vsyncadd [#allocation8], 4294966768 }
  0x19   :  { %864 = dma.done.wait [#allocation11], 16  }
  0x1a   :  { %865 = vsyncadd [#allocation11], 4294967280  ;;  %v121_v0 = vld [vmem:[#allocation4 + $0x18] sm:$0xff]  ;;  %v120_v1 = vld [vmem:[#allocation4 + $0x10] sm:$0xff]  ;;  %vm126_vm0 = vcmask 261120   ;;  %v154_v10 = vlaneseq  ;;  %v874_v16 = vmov 0.5  }
  0x1b   :  { %v153_v2 = vld [vmem:[#allocation6 + $0x18] sm:$0xff]  ;;  %142 = vmatpush.msra.mxu0 %v121_v0  ;;  %v152_v3 = vld [vmem:[#allocation6 + $0x10] sm:$0xff]  ;;  %v119_v4 = vld [vmem:[#allocation4 + $0x8] sm:$0xff]  ;;  %s876_s13 = smov 32   ;;  %vm590_vm4 = vcmask 1040384   ;;  %vm592_vm5 = vcmask 1041408  }
  0x1c   :  { %178 = vmatpush.msra.mxu1 %v153_v2  ;;  %v151_v5 = vld [vmem:[#allocation6 + $0x8] sm:$0xff]  ;;  %230 = vmatpush.msra.mxu2 %v153_v2  ;;  %v118_v6 = vld [vmem:[#allocation4] sm:$0xff]  ;;  %v117_v8 = vld [vmem:[#allocation2] sm:$0xff]  ;;  %v155_v11 = vand.u32 127, %v154_v10  ;;  %vm594_vm6 = vcmask 1042432   ;;  %vm596_vm7 = vcmask 1043456  }
  0x1d   :  { %284 = vmatpush.msra.mxu3 %v153_v2  ;;  %143 = vmatpush.msra.mxu0 %v120_v1  ;;  %v150_v7 = vld [vmem:[#allocation6] sm:$0xff]  ;;  %v161_v9 = vld [vmem:[%s1045_s1] sm:$0x1]  ;;  %s875_s1 = smov 64   ;;  %vm598_vm8 = vcmask 1044480   ;;  %vm600_vm9 = vcmask 1045504  }
  0x1e   :  { %179 = vmatpush.msra.mxu1 %v152_v3  ;;  %231 = vmatpush.msra.mxu2 %v152_v3  ;;  %vm156_vm1 = vcmp.ge.s32.totalorder %v155_v11, 64  ;;  %vm157_vm2 = vcmp.lt.s32.totalorder %v155_v11, 96  ;;  %v679_v12 = vld [vmem:[#allocation7] ss:$0 sm:$0xff]  ;;  %v680_v24 = vld [vmem:[%s1046_s2] ss:$0 sm:$0xff] }
  0x1f   :  { %285 = vmatpush.msra.mxu3 %v152_v3  ;;  %144 = vmatpush.msra.mxu0 %v119_v4  ;;  %vm158_vm3 = vmand %vm156_vm1, %vm157_vm2  ;;  %vm602_vm10 = vcmask 1046528   ;;  %vm643_vm11 = vcmask 523264  }
  0x20   :  { %180 = vmatpush.msra.mxu1 %v151_v5  ;;  %232 = vmatpush.msra.mxu2 %v151_v5  ;;  %v956_v17 = vsel %vm158_vm3, 1.0, %v874_v16  ;;  %v960_v21 = vsel %vm158_vm3, 0.0, %v874_v16 }
  0x21   :  { %286 = vmatpush.msra.mxu3 %v151_v5  ;;  %145 = vmatpush.msra.mxu0 %v118_v6 }
  0x22   :  { %181 = vmatpush.msra.mxu1 %v150_v7  ;;  %658 = vmatmul.msk.f32.vlgmr.msra.gmra.mxu0 %vm126_vm0, %v117_v8 }
  0x23   :  { %659 = vmatmul.msk.f32.vlgmr.msra.gmra.mxu1 %vm126_vm0, %v161_v9  ;;  %233 = vmatpush.msra.mxu2 %v150_v7 }
  0x24   :  { %287 = vmatpush.msra.mxu3 %v150_v7  ;;  %338 = vmatpush.msrb.mxu0 %v153_v2 }
  0x25   :  { %392 = vmatpush.msrb.mxu1 %v153_v2  ;;  %446 = vmatpush.msrb.mxu2 %v153_v2 }
  0x26   :  { %500 = vmatpush.msrb.mxu3 %v153_v2  ;;  %339 = vmatpush.msrb.mxu0 %v152_v3 }
  0x27   :  { %393 = vmatpush.msrb.mxu1 %v152_v3  ;;  %447 = vmatpush.msrb.mxu2 %v152_v3 }
  0x28   :  { %501 = vmatpush.msrb.mxu3 %v152_v3  ;;  %340 = vmatpush.msrb.mxu0 %v151_v5 }
  0x29   :  { %394 = vmatpush.msrb.mxu1 %v151_v5  ;;  %448 = vmatpush.msrb.mxu2 %v151_v5 }
  0x2a   :  { %502 = vmatpush.msrb.mxu3 %v151_v5  ;;  %341 = vmatpush.msrb.mxu0 %v150_v7 }
  0x2b   :  { %395 = vmatpush.msrb.mxu1 %v150_v7  ;;  %449 = vmatpush.msrb.mxu2 %v150_v7 }
  0x2c   :  { %503 = vmatpush.msrb.mxu3 %v150_v7  ;;  %554 = vmatpush.msra.mxu0 %v153_v2 }
  0x2e   :  { %555 = vmatpush.msra.mxu0 %v152_v3 }
  0x30   :  { %556 = vmatpush.msra.mxu0 %v151_v5 }
  0x32   :  { %557 = vmatpush.msra.mxu0 %v150_v7 }
  0x9f   :  { %v147_v13 = vpop.f32.mrf.mxu0 }
  0xa0   :  { %v183_v14 = vpop.f32.mrf.mxu1  ;;  %v954_v15 = vadd.f32 %v679_v12, %v147_v13 }
  0xa2   :  { %v186_v18 = vadd.f32 %v183_v14, %v954_v15 }
  0xa4   :  { %v187_v19 = vmul.f32 %v186_v18, %v956_v17 }
  0xa6   :  { %682 = vtanh.f32 %v187_v19 }
  0xac   :  { %v683_v20 = vpop.eup %682 }
  0xad   :  { %v189_v22 = vmul.f32 %v683_v20, %v956_v17 }
  0xaf   :  { %v190_v23 = vadd.f32 %v189_v22, %v960_v21 }
  0xb1   :  { %198 = vrot.lane.b32.xlu0 %v190_v23, %s875_s1 }
  0xb9   :  { %193 = vrot.lane.b32.xlu0 %v680_v24, %s876_s13 }
 0x123   :  { %v199_v25 = vpop.permute.xlu0 %198 }
 0x124   :  { %v201_v26 = vmul.f32 %v199_v25, %v190_v23 }
 0x126   :  { %203 = vrot.lane.b32.xlu1 %v201_v26, %s876_s13 }
 0x12b   :  { %v194_v27 = vpop.permute.xlu0 %193 }
 0x12c   :  { %v196_v28 = vmul.f32 %v194_v27, %v190_v23 }
 0x198   :  { %v204_v29 = vpop.permute.xlu1 %203 }
 0x199   :  { %v206_v30 = vadd.f32 %v204_v29, %v196_v28 }
 0x19b   :  { %684 = vtanh.f32 %v206_v30  ;;  %v247_v44 = vrot.slane %v206_v30, 7 }
 0x1a1   :  { %v685_v31 = vpop.eup %684 }
 0x1a2   :  { %209 = vrot.lane.b32.xlu1 %v685_v31, %s875_s1 }
 0x214   :  { %v210_v32 = vpop.permute.xlu1 %209 }
 0x215   :  { %v212_v33 = vmul.f32 %v210_v32, %v190_v23 }
 0x217   :  { %214 = vrot.lane.b32.xlu2 %v212_v33, %s876_s13 }
 0x271   :  { %v215_v34 = vpop.permute.xlu2 %214 }
 0x272   :  { %660 = vmatmul.msk.f32.vlgmr.msra.gmra.mxu2 %vm126_vm0, %v215_v34 }
 0x2f5   :  { %v235_v35 = vpop.f32.mrf.mxu2 }
 0x2f6   :  { %v239_v36 = vrot.slane %v235_v35, 7 }
 0x2f8   :  { %v241_v37 = vadd.f32 %v239_v36, %v954_v15 }
 0x2fa   :  { %v242_v38 = vmul.f32 %v241_v37, %v956_v17 }
 0x2fc   :  { %686 = vtanh.f32 %v242_v38 }
 0x302   :  { %v687_v39 = vpop.eup %686 }
 0x303   :  { %v244_v40 = vmul.f32 %v687_v39, %v956_v17 }
 0x305   :  { %v245_v41 = vadd.f32 %v244_v40, %v960_v21 }
 0x307   :  { %251 = vrot.lane.b32.xlu2 %v245_v41, %s875_s1  ;;  %v249_v45 = vmul.f32 %v247_v44, %v245_v41 }
 0x361   :  { %v252_v42 = vpop.permute.xlu2 %251 }
 0x362   :  { %v254_v43 = vmul.f32 %v252_v42, %v245_v41 }
 0x364   :  { %256 = vrot.lane.b32.xlu0 %v254_v43, %s876_s13 }
 0x3d6   :  { %v257_v46 = vpop.permute.xlu0 %256 }
 0x3d7   :  { %v259_v47 = vadd.f32 %v257_v46, %v249_v45 }
 0x3d9   :  { %688 = vtanh.f32 %v259_v47  ;;  %v301_v62 = vrot.slane %v259_v47, 7 }
 0x3df   :  { %v689_v48 = vpop.eup %688 }
 0x3e0   :  { %262 = vrot.lane.b32.xlu1 %v689_v48, %s875_s1 }
 0x452   :  { %v263_v49 = vpop.permute.xlu1 %262 }
 0x453   :  { %v265_v50 = vmul.f32 %v263_v49, %v245_v41 }
 0x455   :  { %v267_v51 = vrot.slane %v265_v50, 1  ;;  %v591_v5 = vsel %vm590_vm4, %v212_v33, %v265_v50 }
 0x457   :  { %268 = vrot.lane.b32.xlu2 %v267_v51, %s876_s13 }
 0x4b1   :  { %v269_v52 = vpop.permute.xlu2 %268 }
 0x4b2   :  { %661 = vmatmul.msk.f32.vlgmr.msra.gmra.mxu3 %vm126_vm0, %v269_v52 }
 0x535   :  { %v289_v53 = vpop.f32.mrf.mxu3 }
 0x536   :  { %v293_v54 = vrot.slane %v289_v53, 6 }
 0x538   :  { %v295_v55 = vadd.f32 %v293_v54, %v954_v15 }
 0x53a   :  { %v296_v56 = vmul.f32 %v295_v55, %v956_v17 }
 0x53c   :  { %690 = vtanh.f32 %v296_v56 }
 0x542   :  { %v691_v57 = vpop.eup %690 }
 0x543   :  { %v298_v58 = vmul.f32 %v691_v57, %v956_v17 }
 0x545   :  { %v299_v59 = vadd.f32 %v298_v58, %v960_v21 }
 0x547   :  { %305 = vrot.lane.b32.xlu0 %v299_v59, %s875_s1  ;;  %v303_v63 = vmul.f32 %v301_v62, %v299_v59 }
 0x5b9   :  { %v306_v60 = vpop.permute.xlu0 %305 }
 0x5ba   :  { %v308_v61 = vmul.f32 %v306_v60, %v299_v59 }
 0x5bc   :  { %310 = vrot.lane.b32.xlu1 %v308_v61, %s876_s13 }
 0x62e   :  { %v311_v0 = vpop.permute.xlu1 %310 }
 0x62f   :  { %v313_v1 = vadd.f32 %v311_v0, %v303_v63 }
 0x631   :  { %692 = vtanh.f32 %v313_v1  ;;  %v355_v20 = vrot.slane %v313_v1, 7 }
 0x637   :  { %v693_v2 = vpop.eup %692 }
 0x638   :  { %316 = vrot.lane.b32.xlu2 %v693_v2, %s875_s1 }
 0x692   :  { %v317_v3 = vpop.permute.xlu2 %316 }
 0x693   :  { %v319_v4 = vmul.f32 %v317_v3, %v299_v59 }
 0x695   :  { %v321_v6 = vrot.slane %v319_v4, 2  ;;  %v593_v7 = vsel %vm592_vm5, %v591_v5, %v319_v4 }
 0x697   :  { %322 = vrot.lane.b32.xlu0 %v321_v6, %s876_s13 }
 0x709   :  { %v323_v8 = vpop.permute.xlu0 %322 }
 0x70a   :  { %662 = vmatmul.msk.f32.vlgmr.msrb.gmra.mxu0 %vm126_vm0, %v323_v8 }
 0x787   :  { %v343_v9 = vpop.f32.mrf.mxu0 }
 0x788   :  { %v347_v10 = vrot.slane %v343_v9, 5 }
 0x78a   :  { %v349_v11 = vadd.f32 %v347_v10, %v954_v15 }
 0x78c   :  { %v350_v12 = vmul.f32 %v349_v11, %v956_v17 }
 0x78e   :  { %694 = vtanh.f32 %v350_v12 }
 0x794   :  { %v695_v13 = vpop.eup %694 }
 0x795   :  { %v352_v14 = vmul.f32 %v695_v13, %v956_v17 }
 0x797   :  { %v353_v16 = vadd.f32 %v352_v14, %v960_v21 }
 0x799   :  { %359 = vrot.lane.b32.xlu1 %v353_v16, %s875_s1  ;;  %v357_v22 = vmul.f32 %v355_v20, %v353_v16 }
 0x80b   :  { %v360_v18 = vpop.permute.xlu1 %359 }
 0x80c   :  { %v362_v19 = vmul.f32 %v360_v18, %v353_v16 }
 0x80e   :  { %364 = vrot.lane.b32.xlu2 %v362_v19, %s876_s13 }
 0x868   :  { %v365_v23 = vpop.permute.xlu2 %364 }
 0x869   :  { %v367_v24 = vadd.f32 %v365_v23, %v357_v22 }
 0x86b   :  { %696 = vtanh.f32 %v367_v24  ;;  %v409_v40 = vrot.slane %v367_v24, 7 }
 0x871   :  { %v697_v25 = vpop.eup %696 }
 0x872   :  { %370 = vrot.lane.b32.xlu0 %v697_v25, %s875_s1 }
 0x8e4   :  { %v371_v26 = vpop.permute.xlu0 %370 }
 0x8e5   :  { %v373_v27 = vmul.f32 %v371_v26, %v353_v16 }
 0x8e7   :  { %v375_v28 = vrot.slane %v373_v27, 3  ;;  %v595_v29 = vsel %vm594_vm6, %v593_v7, %v373_v27 }
 0x8e9   :  { %376 = vrot.lane.b32.xlu1 %v375_v28, %s876_s13 }
 0x95b   :  { %v377_v30 = vpop.permute.xlu1 %376 }
 0x95c   :  { %663 = vmatmul.msk.f32.vlgmr.msrb.gmra.mxu1 %vm126_vm0, %v377_v30 }
 0x9d9   :  { %v397_v31 = vpop.f32.mrf.mxu1 }
 0x9da   :  { %v401_v32 = vrot.slane %v397_v31, 4 }
 0x9dc   :  { %v403_v33 = vadd.f32 %v401_v32, %v954_v15 }
 0x9de   :  { %v404_v34 = vmul.f32 %v403_v33, %v956_v17 }
 0x9e0   :  { %698 = vtanh.f32 %v404_v34 }
 0x9e6   :  { %v699_v35 = vpop.eup %698 }
 0x9e7   :  { %v406_v36 = vmul.f32 %v699_v35, %v956_v17 }
 0x9e9   :  { %v407_v37 = vadd.f32 %v406_v36, %v960_v21 }
 0x9eb   :  { %413 = vrot.lane.b32.xlu2 %v407_v37, %s875_s1  ;;  %v411_v41 = vmul.f32 %v409_v40, %v407_v37  ;;  %v608_v40 = vld [vmem:[#allocation9 + $0x18] sm:$0xff] }
 0x9ec   :  { %630 = vmatpush.msra.mxu1 %v608_v40 }
 0xa45   :  { %v414_v38 = vpop.permute.xlu2 %413 }
 0xa46   :  { %v416_v39 = vmul.f32 %v414_v38, %v407_v37 }
 0xa48   :  { %418 = vrot.lane.b32.xlu0 %v416_v39, %s876_s13 }
 0xaba   :  { %v419_v42 = vpop.permute.xlu0 %418 }
 0xabb   :  { %v421_v43 = vadd.f32 %v419_v42, %v411_v41  ;;  %v607_v41 = vld [vmem:[#allocation9 + $0x10] sm:$0xff] }
 0xabc   :  { %631 = vmatpush.msra.mxu1 %v607_v41 }
 0xabd   :  { %700 = vtanh.f32 %v421_v43  ;;  %v463_v59 = vrot.slane %v421_v43, 7 }
 0xac3   :  { %v701_v44 = vpop.eup %700 }
 0xac4   :  { %424 = vrot.lane.b32.xlu1 %v701_v44, %s875_s1 }
 0xb36   :  { %v425_v45 = vpop.permute.xlu1 %424 }
 0xb37   :  { %v427_v46 = vmul.f32 %v425_v45, %v407_v37 }
 0xb39   :  { %v429_v47 = vrot.slane %v427_v46, 4  ;;  %v597_v48 = vsel %vm596_vm7, %v595_v29, %v427_v46 }
 0xb3b   :  { %430 = vrot.lane.b32.xlu2 %v429_v47, %s876_s13 }
 0xb95   :  { %v431_v49 = vpop.permute.xlu2 %430 }
 0xb96   :  { %664 = vmatmul.msk.f32.vlgmr.msrb.gmra.mxu2 %vm126_vm0, %v431_v49 }
 0xc19   :  { %v451_v50 = vpop.f32.mrf.mxu2 }
 0xc1a   :  { %v455_v51 = vrot.slane %v451_v50, 3 }
 0xc1c   :  { %v457_v52 = vadd.f32 %v455_v51, %v954_v15  ;;  %v681_v51 = vld [vmem:[#allocation10] ss:$0 sm:$0xff] }
 0xc1e   :  { %v458_v53 = vmul.f32 %v457_v52, %v956_v17 }
 0xc20   :  { %702 = vtanh.f32 %v458_v53 }
 0xc26   :  { %v703_v54 = vpop.eup %702 }
 0xc27   :  { %v460_v55 = vmul.f32 %v703_v54, %v956_v17 }
 0xc29   :  { %v461_v56 = vadd.f32 %v460_v55, %v960_v21 }
 0xc2b   :  { %467 = vrot.lane.b32.xlu0 %v461_v56, %s875_s1  ;;  %v465_v60 = vmul.f32 %v463_v59, %v461_v56 }
 0xc9d   :  { %v468_v57 = vpop.permute.xlu0 %467 }
 0xc9e   :  { %v470_v58 = vmul.f32 %v468_v57, %v461_v56 }
 0xca0   :  { %472 = vrot.lane.b32.xlu1 %v470_v58, %s876_s13 }
 0xd12   :  { %v473_v61 = vpop.permute.xlu1 %472 }
 0xd13   :  { %v475_v62 = vadd.f32 %v473_v61, %v465_v60 }
 0xd15   :  { %704 = vtanh.f32 %v475_v62  ;;  %v517_v14 = vrot.slane %v475_v62, 7 }
 0xd1b   :  { %v705_v63 = vpop.eup %704 }
 0xd1c   :  { %478 = vrot.lane.b32.xlu2 %v705_v63, %s875_s1 }
 0xd76   :  { %v479_v0 = vpop.permute.xlu2 %478 }
 0xd77   :  { %v481_v1 = vmul.f32 %v479_v0, %v461_v56 }
 0xd79   :  { %v483_v2 = vrot.slane %v481_v1, 5  ;;  %v599_v3 = vsel %vm598_vm8, %v597_v48, %v481_v1 }
 0xd7b   :  { %484 = vrot.lane.b32.xlu0 %v483_v2, %s876_s13 }
 0xded   :  { %v485_v4 = vpop.permute.xlu0 %484 }
 0xdee   :  { %665 = vmatmul.msk.f32.vlgmr.msrb.gmra.mxu3 %vm126_vm0, %v485_v4 }
 0xe71   :  { %v505_v5 = vpop.f32.mrf.mxu3 }
 0xe72   :  { %v509_v6 = vrot.slane %v505_v5, 2 }
 0xe74   :  { %v511_v7 = vadd.f32 %v509_v6, %v954_v15 }
 0xe76   :  { %v512_v8 = vmul.f32 %v511_v7, %v956_v17 }
 0xe78   :  { %706 = vtanh.f32 %v512_v8 }
 0xe7e   :  { %v707_v9 = vpop.eup %706 }
 0xe7f   :  { %v514_v10 = vmul.f32 %v707_v9, %v956_v17 }
 0xe81   :  { %v515_v11 = vadd.f32 %v514_v10, %v960_v21 }
 0xe83   :  { %521 = vrot.lane.b32.xlu1 %v515_v11, %s875_s1  ;;  %v519_v16 = vmul.f32 %v517_v14, %v515_v11 }
 0xef5   :  { %v522_v12 = vpop.permute.xlu1 %521 }
 0xef6   :  { %v524_v13 = vmul.f32 %v522_v12, %v515_v11 }
 0xef8   :  { %526 = vrot.lane.b32.xlu2 %v524_v13, %s876_s13 }
 0xf52   :  { %v527_v18 = vpop.permute.xlu2 %526 }
 0xf53   :  { %v529_v19 = vadd.f32 %v527_v18, %v519_v16 }
 0xf55   :  { %708 = vtanh.f32 %v529_v19  ;;  %v571_v36 = vrot.slane %v529_v19, 7 }
 0xf5b   :  { %v709_v20 = vpop.eup %708 }
 0xf5c   :  { %532 = vrot.lane.b32.xlu0 %v709_v20, %s875_s1 }
 0xfce   :  { %v533_v22 = vpop.permute.xlu0 %532 }
 0xfcf   :  { %v535_v23 = vmul.f32 %v533_v22, %v515_v11 }
 0xfd1   :  { %v537_v24 = vrot.slane %v535_v23, 6  ;;  %v601_v25 = vsel %vm600_vm9, %v599_v3, %v535_v23 }
 0xfd3   :  { %538 = vrot.lane.b32.xlu1 %v537_v24, %s876_s13 }
0x1045   :  { %v539_v26 = vpop.permute.xlu1 %538 }
0x1046   :  { %666 = vmatmul.msk.f32.vlgmr.msra.gmra.mxu0 %vm126_vm0, %v539_v26 }
0x10c3   :  { %v559_v27 = vpop.f32.mrf.mxu0 }
0x10c4   :  { %v563_v28 = vrot.slane %v559_v27, 1 }
0x10c6   :  { %v565_v29 = vadd.f32 %v563_v28, %v954_v15 }
0x10c8   :  { %v566_v30 = vmul.f32 %v565_v29, %v956_v17 }
0x10ca   :  { %710 = vtanh.f32 %v566_v30 }
0x10d0   :  { %v711_v31 = vpop.eup %710 }
0x10d1   :  { %v568_v32 = vmul.f32 %v711_v31, %v956_v17  ;;  %v606_v17 = vld [vmem:[#allocation9 + $0x8] sm:$0xff] }
0x10d2   :  { %632 = vmatpush.msra.mxu1 %v606_v17 }
0x10d3   :  { %v569_v33 = vadd.f32 %v568_v32, %v960_v21  ;;  %v605_v21 = vld [vmem:[#allocation9] sm:$0xff] }
0x10d4   :  { %633 = vmatpush.msra.mxu1 %v605_v21 }
0x10d5   :  { %575 = vrot.lane.b32.xlu2 %v569_v33, %s875_s1  ;;  %v573_v37 = vmul.f32 %v571_v36, %v569_v33 }
0x112f   :  { %v576_v34 = vpop.permute.xlu2 %575 }
0x1130   :  { %v578_v35 = vmul.f32 %v576_v34, %v569_v33 }
0x1132   :  { %580 = vrot.lane.b32.xlu0 %v578_v35, %s876_s13 }
0x11a4   :  { %v581_v38 = vpop.permute.xlu0 %580 }
0x11a5   :  { %v583_v39 = vadd.f32 %v581_v38, %v573_v37 }
0x11a7   :  { %712 = vtanh.f32 %v583_v39 }
0x11ad   :  { %v713_v15 = vpop.eup %712 }
0x11ae   :  { %586 = vrot.lane.b32.xlu1 %v713_v15, %s875_s1 }
0x1220   :  { %v587_v42 = vpop.permute.xlu1 %586 }
0x1221   :  { %v589_v43 = vmul.f32 %v587_v42, %v569_v33 }
0x1223   :  { %639 = vrot.lane.b32.xlu0 %v589_v43, %s876_s13  ;;  %v603_v44 = vsel %vm602_vm10, %v601_v25, %v589_v43 }
0x1224   :  { %v604_v45 = vmax.f32 %v603_v44, 0.0 }
0x1226   :  { %614 = vrot.lane.b32.xlu2 %v604_v45, %s876_s13 }
0x1280   :  { %v615_v46 = vpop.permute.xlu2 %614 }
0x1281   :  { %667 = vmatmul.msk.f32.vlgmr.msra.gmra.mxu1 %vm126_vm0, %v615_v46 }
0x1295   :  { %v640_v47 = vpop.permute.xlu0 %639 }
0x1296   :  { %v642_v48 = vsel %vm126_vm0, %v640_v47, %v583_v39 }
0x1297   :  { %v644_v49 = vsel %vm643_vm11, %v642_v48, 0.0 }
0x1298   :  { %v646_v50 = vrot.slane %v644_v49, 7 }
0x129a   :  { %649 = vst [vmem:[%s1052_s8 + $0x8] sm:$0x1] %v646_v50 }
0x12fe   :  { %v635_v52 = vpop.f32.mrf.mxu1 }
0x12ff   :  { %v636_v53 = vadd.f32 %v681_v51, %v635_v52 }
0x1301   :  { %648 = vst [vmem:[%s1052_s8] sm:$0xff] %v636_v53 }
0x1302   :  { %654 = vsyncpa [#allocation3], 1 }
0x1303   :  { %655 = vsyncpa [#allocation5], 1 }
0x1304   :  { %656 = vsyncpa [#allocation8], 1 }
0x1305   :  { %657 = vsyncpa [#allocation11], 1 }

</bundles_post_ra>
